<compile_context>
chip_gen: v7x
topology: tpu7x:2x2x1
jax: 0.10.0
libtpu: 0.0.40
codegen_flags: <defaults>
</compile_context>

<pallas_src>
import functools
import math

import jax
import jax.numpy as jnp
from jax.experimental import pallas as pl
from jax.experimental.pallas import tpu as pltpu


# ----------------------------------------------------------------------------
# Generation-aware VMEM budget
# ----------------------------------------------------------------------------
def _vmem_limit_bytes():
    """~3/4 of physical VMEM, capped at 96 MiB (v5e/v6e -> 96 MiB, v7x -> 48 MiB)."""
    cap = None
    try:
        cap = getattr(pltpu.get_tpu_info(), "vmem_capacity_bytes", None)
    except Exception:
        cap = None
    if not cap:
        cap = 64 * 1024 * 1024          # conservative (v7x physical size)
    return int(min(cap * 3 // 4, 96 * 1024 * 1024))


# ----------------------------------------------------------------------------
# Tile planning
# ----------------------------------------------------------------------------
def _seq_tile(t_pad, max_tile):
    """Largest multiple of 128 <= max_tile that divides t_pad (t_pad % 128 == 0)."""
    c = min(max_tile, t_pad)
    while c >= 128:
        if t_pad % c == 0:
            return c
        c -= 128
    return 128


def _plan_attention_tiles(B, T, d, vmem_limit):
    """Pick (tq, tkv, T_pad) for the attention kernel from the VMEM budget."""
    # Rough per-row VMEM cost (bytes) of kernel 2:
    q_row = d * (2 * 2 + 4 * 2 + 4)      # q bf16 x2 bufs + out f32 x2 bufs + acc f32
    kv_row = 2 * d * 2 * 2               # k + v, bf16, double-buffered
    budget = vmem_limit // 4
    tq_max = max(128, min(512, (budget // q_row) // 128 * 128))
    tkv_max = max(128, min(2048, (budget // kv_row) // 128 * 128))

    if T <= min(tq_max, tkv_max):
        tq = tkv = t_pad = T             # whole sequence in one tile, no padding
    else:
        t_pad = -(-T // 128) * 128       # pad to a lane-friendly multiple of 128
        tq = _seq_tile(t_pad, tq_max)
        tkv = _seq_tile(t_pad, tkv_max)

    # v7x megacore: make sure there are >= 2 "parallel" blocks when possible so
    # both TensorCores get work (harmless no-op on v5e/v6e).
    while B * (t_pad // tq) < 2 and tq % 2 == 0 and (tq // 2) % 8 == 0:
        tq //= 2
    return tq, tkv, t_pad


# ----------------------------------------------------------------------------
# Kernel 1: fused QKV projection with a VMEM-resident (d, 3d) weight.
# Emits lane-dense Q, K, V of shape (B, T, d) in bf16.
# ----------------------------------------------------------------------------
def _qkv_proj_kernel(x_ref, w_ref, q_ref, k_ref, v_ref, *, d):
    x = x_ref[0]                                   # (tt, d)  bf16
    w = w_ref[...]                                 # (d, 3d)  bf16, VMEM-resident
    qkv = jnp.dot(x, w, preferred_element_type=jnp.float32)   # (tt, 3d) f32
    q_ref[0] = qkv[:, 0 * d:1 * d].astype(q_ref.dtype)
    k_ref[0] = qkv[:, 1 * d:2 * d].astype(k_ref.dtype)
    v_ref[0] = qkv[:, 2 * d:3 * d].astype(v_ref.dtype)


def _qkv_projection(x, w_fused, *, tt, vmem_limit):
    B, T, d = x.shape
    out_sds = jax.ShapeDtypeStruct((B, T, d), x.dtype)
    kernel = functools.partial(_qkv_proj_kernel, d=d)
    return pl.pallas_call(
        kernel,
        out_shape=(out_sds, out_sds, out_sds),
        grid_spec=pltpu.PrefetchScalarGridSpec(
            num_scalar_prefetch=0,
            grid=(B, T // tt),
            in_specs=[
                pl.BlockSpec((1, tt, d), lambda b, ti: (b, ti, 0)),
                # Full fused weight, constant index_map -> DMA'd once, stays in VMEM.
                pl.BlockSpec((d, 3 * d), lambda b, ti: (0, 0)),
            ],
            out_specs=[
                pl.BlockSpec((1, tt, d), lambda b, ti: (b, ti, 0)),
                pl.BlockSpec((1, tt, d), lambda b, ti: (b, ti, 0)),
                pl.BlockSpec((1, tt, d), lambda b, ti: (b, ti, 0)),
            ],
        ),
        compiler_params=pltpu.CompilerParams(
            dimension_semantics=("parallel", "parallel"),
            vmem_limit_bytes=vmem_limit,
        ),
    )(x, w_fused)


# ----------------------------------------------------------------------------
# Kernel 2: flash-style attention (online softmax over KV tiles), all heads
# processed in-body, fused output projection with a VMEM-resident (d, d) weight.
# ----------------------------------------------------------------------------
def _flash_attn_proj_kernel(q_ref, k_ref, v_ref, wp_ref, o_ref,
                            m_sc, l_sc, acc_sc, *,
                            H, hd, tkv, T_valid, needs_mask):
    kv = pl.program_id(2)
    nkv = pl.num_programs(2)

    @pl.when(kv == 0)
    def _():
        m_sc[...] = jnp.full_like(m_sc, -jnp.inf)
        l_sc[...] = jnp.zeros_like(l_sc)
        acc_sc[...] = jnp.zeros_like(acc_sc)

    q = q_ref[0]            # (tq, d)  bf16, 1/sqrt(hd) already folded into weights
    k = k_ref[0]            # (tkv, d) bf16
    v = v_ref[0]            # (tkv, d) bf16

    if needs_mask:
        # Keys beyond the true sequence length come from zero-padding; mask them.
        col = jax.lax.broadcasted_iota(jnp.int32, (q.shape[0], tkv), 1) + kv * tkv
        key_valid = col < T_valid

    for h in range(H):                  # static unroll over heads (in-body, not grid)
        sl = slice(h * hd, (h + 1) * hd)
        q_h = q[:, sl]                  # (tq, hd)
        k_h = k[:, sl]                  # (tkv, hd)
        v_h = v[:, sl]                  # (tkv, hd)

        # QK^T without materializing a transpose: contract the hd dim of both.
        s = jax.lax.dot_general(q_h, k_h, (((1,), (1,)), ((), ())),
                                preferred_element_type=jnp.float32)  # (tq, tkv)
        if needs_mask:
            s = jnp.where(key_valid, s, jnp.float32(-1e30))

        m_prev = m_sc[:, h:h + 1]                                    # (tq, 1)
        m_new = jnp.maximum(m_prev, jnp.max(s, axis=-1, keepdims=True))
        alpha = jnp.exp(m_prev - m_new)
        p = jnp.exp(s - m_new)                                       # (tq, tkv)
        l_sc[:, h:h + 1] = alpha * l_sc[:, h:h + 1] + jnp.sum(p, axis=-1, keepdims=True)
        acc_sc[:, sl] = alpha * acc_sc[:, sl] + jnp.dot(
            p.astype(v_h.dtype), v_h, preferred_element_type=jnp.float32)
        m_sc[:, h:h + 1] = m_new

    # End of the KV sweep: normalize each head, then one (tq, d) @ (d, d)
    # projection matmul against the resident weight.
    @pl.when(kv == nkv - 1)
    def _():
        for h in range(H):
            sl = slice(h * hd, (h + 1) * hd)
            inv_l = pl.reciprocal(l_sc[:, h:h + 1], approx=False)
            acc_sc[:, sl] = acc_sc[:, sl] * inv_l
        o_ref[0] = jnp.dot(acc_sc[...].astype(wp_ref.dtype), wp_ref[...],
                           preferred_element_type=jnp.float32).astype(o_ref.dtype)


def _flash_attention_proj(q, k, v, wp, out_dtype, *, H, hd, tq, tkv,
                          T_valid, vmem_limit):
    B, T_pad, d = q.shape
    needs_mask = (T_pad != T_valid)
    kernel = functools.partial(_flash_attn_proj_kernel, H=H, hd=hd, tkv=tkv,
                               T_valid=T_valid, needs_mask=needs_mask)
    return pl.pallas_call(
        kernel,
        out_shape=jax.ShapeDtypeStruct((B, T_pad, d), out_dtype),
        grid_spec=pltpu.PrefetchScalarGridSpec(
            num_scalar_prefetch=0,
            grid=(B, T_pad // tq, T_pad // tkv),
            in_specs=[
                pl.BlockSpec((1, tq, d), lambda b, qi, kv: (b, qi, 0)),
                pl.BlockSpec((1, tkv, d), lambda b, qi, kv: (b, kv, 0)),
                pl.BlockSpec((1, tkv, d), lambda b, qi, kv: (b, kv, 0)),
                # Output projection weight: constant index_map -> DMA'd once.
                pl.BlockSpec((d, d), lambda b, qi, kv: (0, 0)),
            ],
            out_specs=pl.BlockSpec((1, tq, d), lambda b, qi, kv: (b, qi, 0)),
            scratch_shapes=[
                pltpu.VMEM((tq, H), jnp.float32),   # running max  m  (per head)
                pltpu.VMEM((tq, H), jnp.float32),   # running sum  l  (per head)
                pltpu.VMEM((tq, d), jnp.float32),   # per-head acc (head-major lanes)
            ],
        ),
        compiler_params=pltpu.CompilerParams(
            dimension_semantics=("parallel", "parallel", "arbitrary"),
            vmem_limit_bytes=vmem_limit,
        ),
    )(q, k, v, wp)


# ----------------------------------------------------------------------------
# Wrapper
# ----------------------------------------------------------------------------
def causal_self_attention(x, w_qkv, w_proj, H, *, compute_dtype=jnp.bfloat16):
    """x: (B, T, d); w_qkv: (d, 3d) so [q|k|v] = x @ w_qkv; w_proj: (d, d)."""
    B, T, d = x.shape
    assert d % H == 0
    hd = d // H
    scale = 1.0 / math.sqrt(hd)

    vmem_limit = _vmem_limit_bytes()
    tq, tkv, T_pad = _plan_attention_tiles(B, T, d, vmem_limit)
    tt = tq

    # Fold the 1/sqrt(hd) score scale into the Q columns of the fused QKV weight.
    w_fused = jnp.concatenate([w_qkv[:, :d] * scale, w_qkv[:, d:]], axis=-1)
    w_fused = w_fused.astype(compute_dtype)
    wp = w_proj.astype(compute_dtype)
    xc = x.astype(compute_dtype)
    if T_pad != T:
        xc = jnp.pad(xc, ((0, 0), (0, T_pad - T), (0, 0)))

    q, k, v = _qkv_projection(xc, w_fused, tt=tt, vmem_limit=vmem_limit)
    out = _flash_attention_proj(q, k, v, wp, x.dtype, H=H, hd=hd, tq=tq, tkv=tkv,
                                T_valid=T, vmem_limit=vmem_limit)
    if T_pad != T:
        out = out[:, :T, :]
    return out


def reference_attention(x, w_qkv, w_proj, H):
    """Pure-JAX f32 reference mirroring the PyTorch forward (eval mode)."""
    B, T, d = x.shape
    hd = d // H
    qkv = x @ w_qkv
    q, k, v = jnp.split(qkv, 3, axis=-1)
    q = q.reshape(B, T, H, hd).transpose(0, 2, 1, 3)
    k = k.reshape(B, T, H, hd).transpose(0, 2, 1, 3)
    v = v.reshape(B, T, H, hd).transpose(0, 2, 1, 3)
    att = jnp.einsum("bhqd,bhkd->bhqk", q, k) / math.sqrt(hd)
    att = jax.nn.softmax(att, axis=-1)
    y = jnp.einsum("bhqk,bhkd->bhqd", att, v)
    y = y.transpose(0, 2, 1, 3).reshape(B, T, d)
    return y @ w_proj


def _run_case(B, T, d, H, seed):
    key = jax.random.PRNGKey(seed)
    kx, kqkv, kproj = jax.random.split(key, 3)
    x = jax.random.normal(kx, (B, T, d), dtype=jnp.float32)
    # PyTorch nn.Linear(d, 3d) weight is (3d, d); we store W^T: (d, 3d) / (d, d).
    bound = 1.0 / math.sqrt(d)
    w_qkv = jax.random.uniform(kqkv, (d, 3 * d), jnp.float32, -bound, bound)
    w_proj = jax.random.uniform(kproj, (d, d), jnp.float32, -bound, bound)

    out = causal_self_attention(x, w_qkv, w_proj, H)
    out = jax.block_until_ready(out)
    ref = reference_attention(x, w_qkv, w_proj, H)
    assert out.shape == (B, T, d)
    assert out.dtype == x.dtype
    max_err = float(jnp.max(jnp.abs(out - ref)))
    # bf16 MXU operands -> loosened tolerance vs the f32 reference.
    assert jnp.allclose(out, ref, atol=5e-2, rtol=5e-2), (
        f"mismatch vs reference (B={B},T={T},d={d},H={H}, max err {max_err})")


if __name__ == "__main__":
    # Small primary test (whole sequence in one tile, no padding).
    _run_case(B=2, T=8, d=32, H=4, seed=0)
    # Exercise multi-tile path: padding (T not a multiple of 128), key masking,
    # multiple q-tiles, single resident KV sweep, hd=64 head slices.
    _run_case(B=1, T=600, d=128, H=2, seed=1)
    print("KERNEL_OK")
</pallas_src>

<mosaic_0001>
module attributes {stable_mosaic.version = 11 : i64} {
  func.func @_qkv_proj_kernel(%arg0: i32, %arg1: i32, %arg2: memref<1x8x32xbf16, #tpu.memory_space<vmem>>, %arg3: memref<32x96xbf16, #tpu.memory_space<vmem>>, %arg4: memref<1x8x32xbf16, #tpu.memory_space<vmem>>, %arg5: memref<1x8x32xbf16, #tpu.memory_space<vmem>>, %arg6: memref<1x8x32xbf16, #tpu.memory_space<vmem>>) attributes {dimension_semantics = [#tpu.dimension_semantics<parallel>, #tpu.dimension_semantics<parallel>], iteration_bounds = array<i64: 2, 1>, scalar_prefetch = 0 : i64, scratch_operands = 0 : i64, tpu.core_type = #tpu.core_type<tc>, window_params = [{transform_indices = @transform_0, window_bounds = array<i64: 1, 8, 32>}, {pipeline_mode = #tpu.pipeline_mode<synchronous>, transform_indices = @transform_1, window_bounds = array<i64: 32, 96>}, {transform_indices = @transform_2, window_bounds = array<i64: 1, 8, 32>}, {transform_indices = @transform_3, window_bounds = array<i64: 1, 8, 32>}, {transform_indices = @transform_4, window_bounds = array<i64: 1, 8, 32>}]} {
    %c0 = arith.constant 0 : index
    %c0_0 = arith.constant 0 : index
    %c0_1 = arith.constant 0 : index
    %0 = vector.load %arg2[%c0, %c0_0, %c0_1] : memref<1x8x32xbf16, #tpu.memory_space<vmem>>, vector<1x8x32xbf16>
    %1 = vector.shape_cast %0 : vector<1x8x32xbf16> to vector<8x32xbf16>
    %c0_2 = arith.constant 0 : index
    %c0_3 = arith.constant 0 : index
    %2 = vector.load %arg3[%c0_2, %c0_3] : memref<32x96xbf16, #tpu.memory_space<vmem>>, vector<32x96xbf16>
    %cst = arith.constant dense<0.000000e+00> : vector<8x96xf32>
    %3 = tpu.matmul %1, %2, %cst {dimension_numbers = #tpu.dot_dimension_numbers<[1], [0], [0], [1], [0, 0, 1, 1], [], []>} : vector<8x32xbf16>, vector<32x96xbf16>, vector<8x96xf32> -> vector<8x96xf32>
    %4 = vector.extract_strided_slice %3 {offsets = [0, 0], sizes = [8, 32], strides = [1, 1]} : vector<8x96xf32> to vector<8x32xf32>
    %5 = arith.truncf %4 : vector<8x32xf32> to vector<8x32xbf16>
    %c0_4 = arith.constant 0 : index
    %c0_5 = arith.constant 0 : index
    %c0_6 = arith.constant 0 : index
    %6 = vector.load %arg4[%c0_4, %c0_5, %c0_6] : memref<1x8x32xbf16, #tpu.memory_space<vmem>>, vector<1x8x32xbf16>
    %7 = vector.shape_cast %6 : vector<1x8x32xbf16> to vector<8x32xbf16>
    %8 = vector.shape_cast %5 : vector<8x32xbf16> to vector<1x8x32xbf16>
    tpu.vector_store %arg4[%c0_4, %c0_5, %c0_6], %8 {strides = array<i32>} : memref<1x8x32xbf16, #tpu.memory_space<vmem>>, vector<1x8x32xbf16>,
    %9 = vector.extract_strided_slice %3 {offsets = [0, 32], sizes = [8, 32], strides = [1, 1]} : vector<8x96xf32> to vector<8x32xf32>
    %10 = arith.truncf %9 : vector<8x32xf32> to vector<8x32xbf16>
    %c0_7 = arith.constant 0 : index
    %c0_8 = arith.constant 0 : index
    %c0_9 = arith.constant 0 : index
    %11 = vector.load %arg5[%c0_7, %c0_8, %c0_9] : memref<1x8x32xbf16, #tpu.memory_space<vmem>>, vector<1x8x32xbf16>
    %12 = vector.shape_cast %11 : vector<1x8x32xbf16> to vector<8x32xbf16>
    %13 = vector.shape_cast %10 : vector<8x32xbf16> to vector<1x8x32xbf16>
    tpu.vector_store %arg5[%c0_7, %c0_8, %c0_9], %13 {strides = array<i32>} : memref<1x8x32xbf16, #tpu.memory_space<vmem>>, vector<1x8x32xbf16>,
    %14 = vector.extract_strided_slice %3 {offsets = [0, 64], sizes = [8, 32], strides = [1, 1]} : vector<8x96xf32> to vector<8x32xf32>
    %15 = arith.truncf %14 : vector<8x32xf32> to vector<8x32xbf16>
    %c0_10 = arith.constant 0 : index
    %c0_11 = arith.constant 0 : index
    %c0_12 = arith.constant 0 : index
    %16 = vector.load %arg6[%c0_10, %c0_11, %c0_12] : memref<1x8x32xbf16, #tpu.memory_space<vmem>>, vector<1x8x32xbf16>
    %17 = vector.shape_cast %16 : vector<1x8x32xbf16> to vector<8x32xbf16>
    %18 = vector.shape_cast %15 : vector<8x32xbf16> to vector<1x8x32xbf16>
    tpu.vector_store %arg6[%c0_10, %c0_11, %c0_12], %18 {strides = array<i32>} : memref<1x8x32xbf16, #tpu.memory_space<vmem>>, vector<1x8x32xbf16>,
    return
  }
  func.func @transform_0(%arg0: i32, %arg1: i32) -> (i32, i32, i32) {
    %c0_i32 = arith.constant 0 : i32
    %c0_i32_0 = arith.constant 0 : i32
    return %arg0, %arg1, %c0_i32 : i32, i32, i32
  }
  func.func @transform_1(%arg0: i32, %arg1: i32) -> (i32, i32) {
    %c0_i32 = arith.constant 0 : i32
    %c0_i32_0 = arith.constant 0 : i32
    %c0_i32_1 = arith.constant 0 : i32
    return %c0_i32, %c0_i32_0 : i32, i32
  }
  func.func @transform_2(%arg0: i32, %arg1: i32) -> (i32, i32, i32) {
    %c0_i32 = arith.constant 0 : i32
    %c0_i32_0 = arith.constant 0 : i32
    return %arg0, %arg1, %c0_i32 : i32, i32, i32
  }
  func.func @transform_3(%arg0: i32, %arg1: i32) -> (i32, i32, i32) {
    %c0_i32 = arith.constant 0 : i32
    %c0_i32_0 = arith.constant 0 : i32
    return %arg0, %arg1, %c0_i32 : i32, i32, i32
  }
  func.func @transform_4(%arg0: i32, %arg1: i32) -> (i32, i32, i32) {
    %c0_i32 = arith.constant 0 : i32
    %c0_i32_0 = arith.constant 0 : i32
    return %arg0, %arg1, %c0_i32 : i32, i32, i32
  }
}

</mosaic_0001>

<bundles_post_ra>
// kernel: tpu_custom_call.1
= control target key start
LH: loop header
LB: loop body
LE: loop exit
PB: predicated region body
PF: predicated region fallthrough
CT: control target
= control target key end

     0   :  { %10 = vsyncpa [#allocation3], 0  ;;  %s1215_s0 = inlined_call_operand.hbm [shape: bf16[2,8,32], index: 0, kind: input, shape index: {}]   ;;  %s1216_s1 = inlined_call_operand.hbm [shape: bf16[32,96], index: 1, kind: input, shape index: {}]   ;;  %s1217_s2 = inlined_call_operand.hbm [shape: bf16[2,8,32], index: 2, kind: output, shape index: {0}]   ;;  %s1218_s3 = inlined_call_operand.hbm [shape: bf16[2,8,32], index: 3, kind: output, shape index: {1}]   ;;  %s1219_s4 = inlined_call_operand.hbm [shape: bf16[2,8,32], index: 4, kind: output, shape index: {2}]  }
   0x1   :  { %12 = vsyncpa [#allocation3 + $0x1], 0 }
   0x2   :  { %13 = vsyncpa [#allocation6], 0 }
   0x3   :  { %14 = vsyncpa [#allocation4], 0 }
   0x4   :  { %16 = vsyncpa [#allocation4 + $0x1], 0 }
   0x5   :  { %17 = vsyncpa [#allocation9], 0 }
   0x6   :  { %19 = vsyncpa [#allocation9 + $0x1], 0  ;;  %s919_s15 = smov 0   ;;  %s921_s16 = smov 0  }
   0x7   :  { %s923_s17 = smov 0   ;;  %s925_s18 = smov 0  }
   0x8   :  { %s927_s19 = smov 0   ;;  %s929_s20 = smov 0  }
   0x9 LB: > { %s950_s21 = sadd.s32 4294967295, %s881_s20   ;;  %s550_s22 = sadd.s32 4294967294, %s881_s20   ;;  %s881_s20 = sphi %s929_s20, %s25_s20   ;;  %s877_s19 = sphi %s927_s19, %s1241_s19   ;;  %s873_s18 = sphi %s925_s18, %s1240_s18   ;;  %s869_s17 = sphi %s923_s17, %s1239_s17   ;;  %s865_s16 = sphi %s921_s16, %s1238_s16   ;;  %s861_s15 = sphi %s919_s15, %s1237_s15  }
   0xa   : > { %p59_p0 = scmp.ne.s32.totalorder %s865_s16, %s861_s15  ;;  %p1220_p1 = scmp.eq.s32.totalorder %s950_s21, 0 }
   0xb   : > { %p112_p3 = scmp.eq.s32.totalorder %s550_s22, 1  ;;  %p551_p5 = scmp.ge.s32.totalorder %s881_s20, 1 }
   0xc   : > { %p961_p4 = por %p1220_p1, %p59_p0  ;;  %p175_p7 = scmp.lt.s32.totalorder %s881_s20, 3 }
   0xd   : > { %p966_p6 = por %p112_p3, %p59_p0  ;;  %s883_s26 = smov [#allocation5]  }
   0xe   : > { %s1223_s23 = scalar_select %p961_p4, 1, 0 }
   0xf   : > { %s1224_s24 = scalar_select %p966_p6, 1, 0 }
  0x10   : > { %p971_p8 = pnand %p551_p5, %p175_p7  ;;  %s187_s27 = sshll.u32 %s883_s26, 4  ;;  %s188_s27 = int_to_ptr.vmem [resolvable:$true] %s187_s27 }
  0x11   : > { %s37_s29 = sadd.s32 1, %s877_s19  ;;  %s677_s6 = scalar_lea.hbm %s1216_s1, 256 }
  0x12   : > { %s1225_s25 = scalar_select %p971_p8, 1, 0 }
  0x13   : > { %p598_p9 = pneg %p971_p8  ;;  %p678_p12 = scmp.ne.s32.totalorder %s1216_s1, %s677_s6 }
  0x14   : > { %p684_p5 = scmp.lt.u32.totalorder %s677_s6, %s1216_s1 }
  0x15   : > { %p980_p11 = pnand %p598_p9, %p1220_p1 }
  0x17   : > { %p679_p13 = pneg %p980_p11 }
  0x19   : > { %p680_p0 = pnand %p679_p13, %p678_p12 }
  0x1b   : > { %p681_p3 = pneg %p680_p0 }
  0x1d   : > { %p686_p7 = pnand %p684_p5, %p681_p3 }
  0x1f   : > { %689 = shalt.err (!%p686_p7)
}
  0x20   : > { %s690_s11 = scalar_lea.vmem %s188_s27, 256  ;;  %p698_p2 = scmp.lt.s32.totalorder %s188_s27, %s188_s27 }
  0x21   : > { %p691_p9 = scmp.ne.s32.totalorder %s188_s27, %s690_s11  ;;  %p699_p6 = scmp.lt.s32.totalorder %s690_s11, %s690_s11 }
  0x23   : > { %p693_p10 = pnand %p691_p9, %p679_p13  ;;  %p700_p4 = por %p699_p6, %p698_p2 }
  0x25   : > { %p694_p1 = pneg %p693_p10 }
  0x27   : > { %p701_p8 = pnand %p700_p4, %p694_p1 }
  0x29   : > { %704 = shalt.err (!%p701_p8)
}
  0x2a   : > { %s884_s12 = smov 64   ;;  %s885_s13 = smov 4  }
  0x2b   : > { %601 = dma.hbm_to_vmem [thread:$0]  (!%p980_p11), %s1216_s1, 256, %s188_s27, [#allocation6], %s884_s12, %s884_s12, %s885_s13  }
  0x2c   : > { %p39_p1 = scmp.ge.s32.totalorder %s37_s29, 2  ;;  %s46_s30 = sadd.s32 1, %s869_s17 }
  0x2d   : > { %p53_p2 = scmp.ne.s32.totalorder %s869_s17, %s865_s16  ;;  %p54_p4 = scmp.eq.s32.totalorder %s881_s20, 0 }
  0x2e   : > { %s1243_s29 = smov (%p39_p1, %s37_s29), 0  ;;  %p1228_p8 = scmp.eq.s32.totalorder %s950_s21, 1 }
  0x2f   : > { %p1007_p6 = por %p54_p4, %p53_p2  ;;  %s41_s28 = ssub.s32 %s877_s19, %s1243_s29 }
  0x30   : > { %p1013_p10 = por %p1228_p8, %p53_p2  ;;  %p617_p12 = scmp.lt.s32.totalorder %s881_s20, 2 }
  0x31   : > { %p44_p11 = scmp.eq.s32.totalorder %s41_s28, 0  ;;  %s201_s27 = sand.u32 1, %s869_s17  }
  0x32   : > { %s554_s7 = sshll.u32 %s201_s27, 2  ;;  %s555_s9 = sshll.u32 %s877_s19, 6 }
  0x33   : > { %s1022_s8 = scalar_select %p44_p11, %s869_s17, %s46_s30  }
  0x34   : > { %s1028_s12 = scalar_lea.hbm %s1215_s0, %s555_s9  ;;  %s205_s13 = scalar_lea.vmem [#allocation2], %s554_s7 }
  0x35   : > { %s213_s14 = sshll.u32 %s205_s13, 4  ;;  %p1034_p13 = pnand %p617_p12, %p1007_p6  ;;  %s1030_s14 = int_to_ptr.vmem [resolvable:$true] %s213_s14 }
  0x36   : > { %s202_s30 = scalar_lea.sflag [#allocation3], %s201_s27  ;;  %s705_s28 = scalar_lea.hbm %s1028_s12, 64 }
  0x37   : > { %p706_p0 = scmp.ne.s32.totalorder %s1028_s12, %s705_s28  ;;  %p707_p3 = pneg %p1034_p13 }
  0x38   : > { %s710_s10 = scalar_lea.hbm %s1215_s0, 128  ;;  %p711_p9 = scmp.lt.u32.totalorder %s1028_s12, %s1215_s0 }
  0x39   : > { %p708_p5 = pnand %p707_p3, %p706_p0  ;;  %p712_p1 = scmp.lt.u32.totalorder %s710_s10, %s705_s28 }
  0x3a   : > { %p714_p4 = scmp.lt.u32.totalorder %s705_s28, %s1028_s12 }
  0x3b   : > { %p709_p7 = pneg %p708_p5  ;;  %p713_p2 = por %p712_p1, %p711_p9 }
  0x3d   : > { %p715_p6 = por %p714_p4, %p713_p2 }
  0x3f   : > { %p716_p8 = pnand %p715_p6, %p709_p7 }
  0x41   : > { %719 = shalt.err (!%p716_p8)
}
  0x42   : > { %s720_s27 = scalar_lea.vmem %s1030_s14, 64  ;;  %s886_s13 = smov [#allocation2]  }
  0x43   : > { %p721_p12 = scmp.ne.s32.totalorder %s1030_s14, %s720_s27  ;;  %s725_s7 = sshll.u32 %s886_s13, 4  ;;  %s726_s7 = int_to_ptr.vmem [resolvable:$false] %s725_s7 }
  0x44   : > { %s727_s9 = scalar_lea.vmem %s726_s7, 128  ;;  %p728_p5 = scmp.lt.s32.totalorder %s1030_s14, %s726_s7 }
  0x45   : > { %p723_p11 = pnand %p721_p12, %p707_p3  ;;  %p729_p9 = scmp.lt.s32.totalorder %s727_s9, %s720_s27 }
  0x47   : > { %p724_p0 = pneg %p723_p11  ;;  %p730_p1 = por %p729_p9, %p728_p5 }
  0x49   : > { %p731_p2 = pnand %p730_p1, %p724_p0 }
  0x4b   : > { %734 = shalt.err (!%p731_p2)
}
  0x4c   : > { %605 = dma.hbm_to_vmem [thread:$0]  (!%p1034_p13), %s1028_s12, 64, %s1030_s14, %s202_s30  }
  0x4d   : > { %p1231_p7 = scmp.ne.s32.totalorder %s1225_s25, 0 }
  0x4e   : > { %s1066_s28 = sand.u32 (!%p1231_p7), 1, %s865_s16   ;;  %p1232_p3 = scmp.ne.s32.totalorder (!%p1231_p7), %s1223_s23, 0 }
  0x4f   : > { %222 = sbr.rel (%p1231_p7) target bundleno = 465 (0x1d1), region = 28  ;;  %s1069_s10 = sshll.u32 (!%p1231_p7), %s1066_s28, 2 }
  0x50   : > { %s225_s5 = scalar_lea.sflag (!%p1231_p7), [#allocation3], %s1066_s28  ;;  %s228_s11 = scalar_lea.vmem (!%p1231_p7), [#allocation2], %s1069_s10 }
  0x56   : > { %844 = dma.done.wait (%p1232_p3), %s225_s5, 64  }
  0x57   : > { %846 = vsyncadd (%p1232_p3), %s225_s5, 4294967232  ;;  %p1233_p13 = scmp.eq.s32.totalorder %s950_s21, 0 }
  0x59   : > { %848 = dma.done.wait (%p1233_p13), [#allocation6], 256   ;;  %p1234_p4 = pmov %p1233_p13 }
  0x5a   : > { %v887_v0 = vmov 0.0   ;;  %vm888_vm0 = vmmov 0   ;;  %v675_v1 = vld [vmem:[#allocation5] sm:$0xff]   ;;  %v676_v2 = vld [vmem:[#allocation5 + $0x8] sm:$0xff]   ;;  %v268_v3 = vld [vmem:[%s228_s11] sm:$0xf] }
  0x5b   : > { %850 = vsyncadd (%p1234_p4), [#allocation6], 4294967040  ;;  %578 = vmatprep.subr.bf16.mxu0 %v887_v0  ;;  %582 = vmatprep.mubr.msk.bf16.mxu0 %vm888_vm0, %v887_v0  ;;  %vm285_vm1 = vcmask 261120   ;;  %s1082_s23 = sshll.u32 %s873_s18, 6  ;;  %s252_s25 = scalar_lea.vmem [#allocation7], %s1069_s10  ;;  %vm330_vm2 = vcmask 257024  }
  0x5c   : > { %579 = vmatpush3.bf16.msra.mxu0 %v675_v1  ;;  %s368_s12 = sshll.u32 %s252_s25, 4  ;;  %s1089_s30 = scalar_lea.hbm %s1217_s2, %s1082_s23  ;;  %s1091_s12 = int_to_ptr.vmem [resolvable:$true] %s368_s12 }
  0x5d   : > { %580 = vmatprep.subr.bf16.mxu0 %v887_v0  ;;  %s889_s18 = smov 96   ;;  %s344_s27 = scalar_lea.sflag [#allocation4], %s1066_s28 }
  0x5e   : > { %s735_s13 = scalar_lea.vmem %s1091_s12, 64  ;;  %s890_s7 = smov [#allocation7]  }
  0x5f   : > { %p736_p6 = scmp.ne.s32.totalorder %s1091_s12, %s735_s13  ;;  %s739_s9 = sshll.u32 %s890_s7, 4  ;;  %s740_s9 = int_to_ptr.vmem [resolvable:$false] %s739_s9 }
  0x60   : > { %581 = vmatpush3.bf16.msra.mxu0 %v676_v2  ;;  %s741_s5 = scalar_lea.vmem %s740_s9, 128  ;;  %p742_p11 = scmp.lt.s32.totalorder %s1091_s12, %s740_s9 }
  0x61   : > { %p737_p8 = pnand %p736_p6, %p1013_p10  ;;  %p743_p0 = scmp.lt.s32.totalorder %s741_s5, %s735_s13 }
  0x63   : > { %583 = vmatmul.mubr.msk.bf16.vlgmr.msra.gmra.mrb[0].mxu0 %vm285_vm1, %v268_v3  ;;  %p738_p12 = pneg %p737_p8  ;;  %p744_p5 = por %p743_p0, %p742_p11 }
  0x65   : > { %p745_p9 = pnand %p744_p5, %p738_p12 }
 0x136   : > { %v323_v4 = vpop.f32.mrb[0].mxu0 }
 0x137   : > { %v329_v5 = vpack.c.bf16 %v323_v4, %v323_v4  ;;  %v584_v6 = vpop.f32.mrb[1].mxu0 }
 0x138   : > { %v326_v7 = vpop.f32.mrb[2].mxu0 }
 0x139   : > { %335 = vrot.lane.b32.xlu0 %v329_v5, %s889_s18  ;;  %v585_v8 = vpop.f32.mrb[3].mxu0  ;;  %331 = vst.msk [vmem:[%s252_s25] sm:$0xf] %vm330_vm2, %v329_v5 }
 0x13a   : > { %748 = shalt.err (!%p745_p9)
}
 0x13b   : > { %s749_s28 = scalar_lea.hbm %s1089_s30, 64  ;;  %s753_s14 = scalar_lea.hbm %s1217_s2, 128 }
 0x13c   : > { %p750_p1 = scmp.ne.s32.totalorder %s1089_s30, %s749_s28  ;;  %p754_p3 = scmp.lt.u32.totalorder %s1089_s30, %s1217_s2 }
 0x13d   : > { %p755_p13 = scmp.lt.u32.totalorder %s753_s14, %s749_s28  ;;  %p757_p6 = scmp.lt.u32.totalorder %s749_s28, %s1089_s30 }
 0x13e   : > { %p751_p2 = pnand %p750_p1, %p1013_p10 }
 0x13f   : > { %p756_p4 = por %p755_p13, %p754_p3 }
 0x140   : > { %p752_p7 = pneg %p751_p2 }
 0x141   : > { %p758_p8 = por %p757_p6, %p756_p4 }
 0x143   : > { %p759_p12 = pnand %p758_p8, %p752_p7 }
 0x145   : > { %762 = shalt.err (!%p759_p12)
}
 0x146   : > { %592 = dma.vmem_to_hbm [thread:$0]  (%p1013_p10), %s1091_s12, 64, %s1089_s30, %s344_s27  }
 0x147   : > { %s891_s13 = smov 64   ;;  %s348_s7 = sand.u32 1, %s950_s21  }
 0x148   : > { %339 = vrot.lane.b32.xlu0 %v329_v5, %s891_s13  ;;  %s259_s9 = scalar_lea.vmem [#allocation8], %s1069_s10  ;;  %s1122_s25 = scalar_lea.hbm %s1218_s3, %s1082_s23 }
 0x149   : > { %s382_s5 = sshll.u32 %s259_s9, 4  ;;  %s266_s14 = scalar_lea.vmem [#allocation10], %s1069_s10  ;;  %s1124_s5 = int_to_ptr.vmem [resolvable:$true] %s382_s5 }
 0x14a   : > { %s1129_s26 = sshll.u32 %s266_s14, 4  ;;  %s1132_s21 = scalar_lea.sflag [#allocation9], %s348_s7  ;;  %s1163_s26 = int_to_ptr.vmem [resolvable:$true] %s1129_s26 }
 0x14b   : > { %s763_s12 = scalar_lea.vmem %s1124_s5, 64  ;;  %s892_s30 = smov [#allocation8]  }
 0x14c   : > { %p764_p11 = scmp.ne.s32.totalorder %s1124_s5, %s763_s12  ;;  %s767_s27 = sshll.u32 %s892_s30, 4  ;;  %s768_s27 = int_to_ptr.vmem [resolvable:$false] %s767_s27 }
 0x14d   : > { %s769_s18 = scalar_lea.vmem %s768_s27, 128  ;;  %p770_p9 = scmp.lt.s32.totalorder %s1124_s5, %s768_s27 }
 0x14e   : > { %p765_p0 = pnand %p764_p11, %p1013_p10  ;;  %p771_p1 = scmp.lt.s32.totalorder %s769_s18, %s763_s12 }
 0x150   : > { %p766_p5 = pneg %p765_p0  ;;  %p772_p2 = por %p771_p1, %p770_p9 }
 0x152   : > { %p773_p7 = pnand %p772_p2, %p766_p5 }
 0x1ab   : > { %v336_v9 = vpop.permute.xlu0 %335 }
 0x1ac   : > { %338 = vst.msk [vmem:[%s259_s9] sm:$0xf] %vm330_vm2, %v336_v9 }
 0x1ad   : > { %776 = shalt.err (!%p773_p7)
}
 0x1ae   : > { %s777_s13 = scalar_lea.hbm %s1122_s25, 64  ;;  %s781_s28 = scalar_lea.hbm %s1218_s3, 128 }
 0x1af   : > { %p778_p3 = scmp.ne.s32.totalorder %s1122_s25, %s777_s13  ;;  %p782_p6 = scmp.lt.u32.totalorder %s1122_s25, %s1218_s3 }
 0x1b0   : > { %p783_p8 = scmp.lt.u32.totalorder %s781_s28, %s777_s13  ;;  %p785_p11 = scmp.lt.u32.totalorder %s777_s13, %s1122_s25 }
 0x1b1   : > { %p779_p13 = pnand %p778_p3, %p1013_p10 }
 0x1b2   : > { %p784_p12 = por %p783_p8, %p782_p6 }
 0x1b3   : > { %p780_p4 = pneg %p779_p13 }
 0x1b4   : > { %p786_p0 = por %p785_p11, %p784_p12 }
 0x1b6   : > { %p787_p5 = pnand %p786_p0, %p780_p4 }
 0x1b8   : > { %790 = shalt.err (!%p787_p5)
}
 0x1b9   : > { %593 = dma.vmem_to_hbm [thread:$0]  (%p1013_p10), %s1124_s5, 64, %s1122_s25, %s1132_s21  }
 0x1ba   : > { %s1160_s18 = scalar_lea.hbm %s1219_s4, %s1082_s23  ;;  %v340_v10 = vpop.permute.xlu0 %339  ;;  %s791_s13 = scalar_lea.vmem %s1163_s26, 64 }
 0x1bb   : > { %342 = vst.msk [vmem:[%s266_s14] sm:$0xf] %vm330_vm2, %v340_v10  ;;  %p792_p9 = scmp.ne.s32.totalorder %s1163_s26, %s791_s13  ;;  %s893_s5 = smov [#allocation10]  }
 0x1bc   : > { %s795_s25 = sshll.u32 %s893_s5, 4  ;;  %s796_s25 = int_to_ptr.vmem [resolvable:$false] %s795_s25 }
 0x1bd   : > { %p793_p1 = pnand %p792_p9, %p1013_p10  ;;  %s797_s7 = scalar_lea.vmem %s796_s25, 128 }
 0x1be   : > { %p798_p7 = scmp.lt.s32.totalorder %s1163_s26, %s796_s25  ;;  %p799_p3 = scmp.lt.s32.totalorder %s797_s7, %s791_s13 }
 0x1bf   : > { %p794_p2 = pneg %p793_p1 }
 0x1c0   : > { %p800_p13 = por %p799_p3, %p798_p7 }
 0x1c2   : > { %p801_p4 = pnand %p800_p13, %p794_p2 }
 0x1c4   : > { %804 = shalt.err (!%p801_p4)
}
 0x1c5   : > { %s805_s10 = scalar_lea.hbm %s1160_s18, 64  ;;  %s809_s9 = scalar_lea.hbm %s1219_s4, 128 }
 0x1c6   : > { %p806_p6 = scmp.ne.s32.totalorder %s1160_s18, %s805_s10  ;;  %p810_p11 = scmp.lt.u32.totalorder %s1160_s18, %s1219_s4 }
 0x1c7   : > { %p811_p0 = scmp.lt.u32.totalorder %s809_s9, %s805_s10  ;;  %p813_p9 = scmp.lt.u32.totalorder %s805_s10, %s1160_s18 }
 0x1c8   : > { %p807_p8 = pnand %p806_p6, %p1013_p10 }
 0x1c9   : > { %p812_p5 = por %p811_p0, %p810_p11 }
 0x1ca   : > { %p808_p12 = pneg %p807_p8 }
 0x1cb   : > { %p814_p1 = por %p813_p9, %p812_p5 }
 0x1cd   : > { %p815_p2 = pnand %p814_p1, %p808_p12 }
 0x1cf   : > { %818 = shalt.err (!%p815_p2)
}
 0x1d0   : > { %594 = dma.vmem_to_hbm [thread:$0]  (%p1013_p10), %s1163_s26, 64, %s1160_s18, %s1132_s21  }
 0x1d1 PF: > { %s408_s30 = sand.u32 1, %s861_s15   ;;  %p1235_p7 = scmp.ne.s32.totalorder %s1224_s24, 0 }
 0x1d2   : > { %p1236_p3 = scmp.ge.s32.totalorder %s881_s20, 2  ;;  %s409_s12 = scalar_lea.sflag [#allocation4], %s408_s30 }
 0x1d4   : > { %p607_p13 = pnand %p1236_p3, %p1235_p7 }
 0x1d6   : > { %852 = dma.done.wait (!%p607_p13), %s409_s12, 64  }
 0x1d7   : > { %854 = vsyncadd (!%p607_p13), %s409_s12, 4294967232  ;;  %s417_s27 = sand.u32 1, %s550_s22  }
 0x1d8   : > { %s418_s13 = scalar_lea.sflag [#allocation9], %s417_s27 }
 0x1d9   : > { %856 = dma.done.wait (!%p607_p13), %s418_s13, 128  }
 0x1da   : > { %858 = vsyncadd (!%p607_p13), %s418_s13, 4294967168  ;;  %s25_s20 = sadd.s32 1, %s881_s20   ;;  %s1237_s15 = smov %s865_s16 }
 0x1db   : > { %p22_p10 = scmp.ge.s32.totalorder %s25_s20, 4   ;;  %s1238_s16 = smov %s869_s17 }
 0x1dc   : > { %s1239_s17 = smov %s1022_s8  ;;  %s1240_s18 = smov %s877_s19 }
 0x1dd   : > { %s1241_s19 = smov %s1243_s29  ;;  %24 = sbr.rel (!%p22_p10) target bundleno = 9 (0x9), region = 109 }
 0x1e4   :  { %432 = vsyncpa [#allocation3], 1 }
 0x1e5   :  { %434 = vsyncpa [#allocation3 + $0x1], 1 }
 0x1e6   :  { %435 = vsyncpa [#allocation6], 1 }
 0x1e7   :  { %436 = vsyncpa [#allocation4], 1 }
 0x1e8   :  { %438 = vsyncpa [#allocation4 + $0x1], 1 }
 0x1e9   :  { %439 = vsyncpa [#allocation9], 1 }
 0x1ea   :  { %441 = vsyncpa [#allocation9 + $0x1], 1 }

</bundles_post_ra>
